<compile_context>
chip_gen: v7x
topology: tpu7x:2x2x1
jax: 0.10.0
libtpu: 0.0.40
codegen_flags: <defaults>
</compile_context>

<pallas_src>
import functools

import jax
import jax.numpy as jnp
from jax.experimental import pallas as pl
from jax.experimental.pallas import tpu as pltpu


def _round_up(x, m):
    return ((x + m - 1) // m) * m


def _mlp_kernel(x_ref, w1_ref, b1_ref, w2_ref, b2_ref, w3_ref, b3_ref, o_ref):
    """One batch tile of the (batch-folded) 3-layer tanh MLP.

    All weights/biases are VMEM-resident (constant-index BlockSpecs); matmuls
    run on the MXU in the weight dtype with f32 accumulation; bias add + tanh
    stay in f32 on the VPU/EUP.
    """
    cdt = w1_ref.dtype                      # MXU operand dtype (bf16 or f32)
    x = x_ref[...].astype(cdt)
    h1 = jnp.tanh(
        jnp.dot(x, w1_ref[...], preferred_element_type=jnp.float32) + b1_ref[...]
    )
    h2 = jnp.tanh(
        jnp.dot(h1.astype(cdt), w2_ref[...], preferred_element_type=jnp.float32)
        + b2_ref[...]
    )
    y = jnp.tanh(
        jnp.dot(h2.astype(cdt), w3_ref[...], preferred_element_type=jnp.float32)
        + b3_ref[...]
    )
    o_ref[...] = y.astype(o_ref.dtype)


@functools.partial(jax.jit, static_argnames=("block_rows", "fold", "use_bf16"))
def action_pred_forward(state, params, *, block_rows=None, fold=None, use_bf16=True):
    """ActionPred.forward: actor MLP as a single batch-tiled Pallas kernel.

    state:  (B, state_dim) float32
    params: dict with w1 (S,64), b1 (1,64), w2 (64,64), b2 (1,64),
            w3 (64,A), b3 (1,A)   (weights stored (in,out) == PyTorch W.T)
    returns (B, A) float32
    """
    B, S = state.shape
    H = params["w1"].shape[1]
    A = params["w3"].shape[1]

    # --- fold factor: pack `fold` consecutive samples into one row -------------
    # Largest of {4, 2, 1} dividing B so the fold reshape is a free bitcast
    # (no jnp.pad anywhere).  f=4 is lane/MXU-optimal on v6e/v7x; f=2 is the
    # MXU sweet spot on v5e -- both are a clear win over f=1, delta is small.
    if fold is None:
        fold = 4 if B % 4 == 0 else (2 if B % 2 == 0 else 1)
    fold = int(fold)
    if B % fold != 0:
        raise ValueError(f"fold={fold} must divide batch size {B}")
    R = B // fold                               # folded rows
    SF, HF, AF = fold * S, fold * H, fold * A   # folded feature widths

    # --- batch tile (in folded rows) -------------------------------------------
    if block_rows is None:
        if R <= 128:
            block_rows = R                      # single full-extent block
        else:
            # >= 2 balanced steps so both v7x TensorCores get work; cap keeps
            # per-step overhead amortized on v5e/v6e at very large B.
            block_rows = min(2048, _round_up(pl.cdiv(R, 2), 8))
    block_rows = int(block_rows)
    if block_rows >= R:
        block_rows = R                          # full dim -> always a legal block
    else:
        block_rows = _round_up(block_rows, 8)   # sublane multiple
    grid_r = pl.cdiv(R, block_rows)             # partial last block handled by Pallas

    # --- operand prep: bf16 MXU operands, f32 bias / tanh ----------------------
    compute_dtype = jnp.bfloat16 if use_bf16 else jnp.float32
    eye = jnp.eye(fold, dtype=compute_dtype)
    w1 = jnp.kron(eye, params["w1"].astype(compute_dtype))   # (SF, HF) block-diag
    w2 = jnp.kron(eye, params["w2"].astype(compute_dtype))   # (HF, HF)
    w3 = jnp.kron(eye, params["w3"].astype(compute_dtype))   # (HF, AF)
    b1 = jnp.tile(params["b1"].astype(jnp.float32), (1, fold))   # (1, HF)
    b2 = jnp.tile(params["b2"].astype(jnp.float32), (1, fold))   # (1, HF)
    b3 = jnp.tile(params["b3"].astype(jnp.float32), (1, fold))   # (1, AF)

    x = state.reshape(R, SF)                    # free row-major reshape (bitcast)

    # --- cost hint so XLA can schedule/overlap this small kernel ---------------
    w_bytes = jnp.dtype(compute_dtype).itemsize * fold * fold * (S * H + H * H + H * A)
    cost = pl.CostEstimate(
        flops=2 * B * fold * (S * H + H * H + H * A),
        transcendentals=B * (2 * H + A),
        bytes_accessed=4 * B * (S + A) + w_bytes + 4 * fold * (2 * H + A),
    )

    def resident(shape):
        # Constant block index -> stays resident in VMEM across grid steps.
        return pl.BlockSpec(shape, lambda i: (0, 0))

    out = pl.pallas_call(
        _mlp_kernel,
        out_shape=jax.ShapeDtypeStruct((R, AF), jnp.float32),
        grid_spec=pltpu.PrefetchScalarGridSpec(
            num_scalar_prefetch=0,
            grid=(grid_r,),
            in_specs=[
                pl.BlockSpec((block_rows, SF), lambda i: (i, 0)),  # folded state tile
                resident((SF, HF)),   # w1 (block-diag)
                resident((1, HF)),    # b1
                resident((HF, HF)),   # w2 (block-diag)
                resident((1, HF)),    # b2
                resident((HF, AF)),   # w3 (block-diag)
                resident((1, AF)),    # b3
            ],
            out_specs=pl.BlockSpec((block_rows, AF), lambda i: (i, 0)),
        ),
        compiler_params=pltpu.CompilerParams(
            dimension_semantics=("parallel",),
        ),
        cost_estimate=cost,
    )(x, w1, b1, w2, b2, w3, b3)

    return out.reshape(B, A)                    # free unfold back to (B, A)


def init_action_pred_params(key, state_dim, action_dim, hidden=64):
    """nn.Linear-style init: U(-1/sqrt(fan_in), 1/sqrt(fan_in))."""
    def linear(k, fan_in, fan_out):
        kw, kb = jax.random.split(k)
        bound = 1.0 / jnp.sqrt(jnp.float32(fan_in))
        w = jax.random.uniform(kw, (fan_in, fan_out), jnp.float32, -bound, bound)
        b = jax.random.uniform(kb, (1, fan_out), jnp.float32, -bound, bound)
        return w, b

    k1, k2, k3 = jax.random.split(key, 3)
    w1, b1 = linear(k1, state_dim, hidden)
    w2, b2 = linear(k2, hidden, hidden)
    w3, b3 = linear(k3, hidden, action_dim)
    return {"w1": w1, "b1": b1, "w2": w2, "b2": b2, "w3": w3, "b3": b3}


def action_pred_reference(state, params):
    h1 = jnp.tanh(state @ params["w1"] + params["b1"])
    h2 = jnp.tanh(h1 @ params["w2"] + params["b2"])
    return jnp.tanh(h2 @ params["w3"] + params["b3"])


if __name__ == "__main__":
    key = jax.random.PRNGKey(0)
    k_params, k_s1, k_s2, k_s3 = jax.random.split(key, 4)

    state_dim, action_dim = 32, 8
    # Note: action_std_init / action_var / MultivariateNormal are unused in forward().
    params = init_action_pred_params(k_params, state_dim, action_dim)

    # 1) Exact f32 path, tiny batch (fold=4, single grid step, full-dim block).
    s1 = jax.random.normal(k_s1, (8, state_dim), jnp.float32)
    o1 = jax.block_until_ready(action_pred_forward(s1, params, use_bf16=False))
    r1 = action_pred_reference(s1, params)
    assert o1.shape == (8, action_dim)
    assert jnp.allclose(o1, r1, atol=1e-5, rtol=1e-5), "f32 mismatch"

    # 2) Default bf16-matmul path with fold=4 and a forced small tile so the
    #    grid has several steps plus a masked partial last block
    #    (B=200 -> 50 folded rows, block_rows=16 -> grid=4, last block ragged).
    s2 = jax.random.normal(k_s2, (200, state_dim), jnp.float32)
    o2 = jax.block_until_ready(action_pred_forward(s2, params, block_rows=16))
    r2 = action_pred_reference(s2, params)
    assert o2.shape == (200, action_dim)
    assert float(jnp.max(jnp.abs(o2 - r2))) < 3e-2, "bf16 mismatch"

    # 3) Odd batch -> fold falls back to 1 (no padding anywhere), exact f32.
    s3 = jax.random.normal(k_s3, (37, state_dim), jnp.float32)
    o3 = jax.block_until_ready(action_pred_forward(s3, params, use_bf16=False))
    r3 = action_pred_reference(s3, params)
    assert o3.shape == (37, action_dim)
    assert jnp.allclose(o3, r3, atol=1e-5, rtol=1e-5), "fold=1 mismatch"

    print("KERNEL_OK")
</pallas_src>

<mosaic_0001>
module attributes {stable_mosaic.version = 11 : i64} {
  func.func @_mlp_kernel(%arg0: i32, %arg1: memref<2x128xf32, #tpu.memory_space<vmem>>, %arg2: memref<128x256xf32, #tpu.memory_space<vmem>>, %arg3: memref<1x256xf32, #tpu.memory_space<vmem>>, %arg4: memref<256x256xf32, #tpu.memory_space<vmem>>, %arg5: memref<1x256xf32, #tpu.memory_space<vmem>>, %arg6: memref<256x32xf32, #tpu.memory_space<vmem>>, %arg7: memref<1x32xf32, #tpu.memory_space<vmem>>, %arg8: memref<2x32xf32, #tpu.memory_space<vmem>>) attributes {dimension_semantics = [#tpu.dimension_semantics<parallel>], iteration_bounds = array<i64: 1>, scalar_prefetch = 0 : i64, scratch_operands = 0 : i64, tpu.core_type = #tpu.core_type<tc>, window_params = [{transform_indices = @transform_0, window_bounds = array<i64: 2, 128>}, {pipeline_mode = #tpu.pipeline_mode<synchronous>, transform_indices = @transform_1, window_bounds = array<i64: 128, 256>}, {pipeline_mode = #tpu.pipeline_mode<synchronous>, transform_indices = @transform_2, window_bounds = array<i64: 1, 256>}, {pipeline_mode = #tpu.pipeline_mode<synchronous>, transform_indices = @transform_3, window_bounds = array<i64: 256, 256>}, {pipeline_mode = #tpu.pipeline_mode<synchronous>, transform_indices = @transform_4, window_bounds = array<i64: 1, 256>}, {pipeline_mode = #tpu.pipeline_mode<synchronous>, transform_indices = @transform_5, window_bounds = array<i64: 256, 32>}, {pipeline_mode = #tpu.pipeline_mode<synchronous>, transform_indices = @transform_6, window_bounds = array<i64: 1, 32>}, {transform_indices = @transform_7, window_bounds = array<i64: 2, 32>}]} {
    %c0 = arith.constant 0 : index
    %c0_0 = arith.constant 0 : index
    %0 = vector.load %arg1[%c0, %c0_0] : memref<2x128xf32, #tpu.memory_space<vmem>>, vector<2x128xf32>
    %c0_1 = arith.constant 0 : index
    %c0_2 = arith.constant 0 : index
    %1 = vector.load %arg2[%c0_1, %c0_2] : memref<128x256xf32, #tpu.memory_space<vmem>>, vector<128x256xf32>
    %cst = arith.constant dense<0.000000e+00> : vector<2x256xf32>
    %2 = tpu.matmul %0, %1, %cst {dimension_numbers = #tpu.dot_dimension_numbers<[1], [0], [0], [1], [0, 0, 1, 1], [], []>} : vector<2x128xf32>, vector<128x256xf32>, vector<2x256xf32> -> vector<2x256xf32>
    %c0_3 = arith.constant 0 : index
    %c0_4 = arith.constant 0 : index
    %3 = vector.load %arg3[%c0_3, %c0_4] : memref<1x256xf32, #tpu.memory_space<vmem>>, vector<1x256xf32>
    %4 = vector.broadcast %3 : vector<1x256xf32> to vector<2x256xf32>
    %5 = arith.addf %2, %4 : vector<2x256xf32>
    %6 = math.tanh %5 : vector<2x256xf32>
    %c0_5 = arith.constant 0 : index
    %c0_6 = arith.constant 0 : index
    %7 = vector.load %arg4[%c0_5, %c0_6] : memref<256x256xf32, #tpu.memory_space<vmem>>, vector<256x256xf32>
    %cst_7 = arith.constant dense<0.000000e+00> : vector<2x256xf32>
    %8 = tpu.matmul %6, %7, %cst_7 {dimension_numbers = #tpu.dot_dimension_numbers<[1], [0], [0], [1], [0, 0, 1, 1], [], []>} : vector<2x256xf32>, vector<256x256xf32>, vector<2x256xf32> -> vector<2x256xf32>
    %c0_8 = arith.constant 0 : index
    %c0_9 = arith.constant 0 : index
    %9 = vector.load %arg5[%c0_8, %c0_9] : memref<1x256xf32, #tpu.memory_space<vmem>>, vector<1x256xf32>
    %10 = vector.broadcast %9 : vector<1x256xf32> to vector<2x256xf32>
    %11 = arith.addf %8, %10 : vector<2x256xf32>
    %12 = math.tanh %11 : vector<2x256xf32>
    %c0_10 = arith.constant 0 : index
    %c0_11 = arith.constant 0 : index
    %13 = vector.load %arg6[%c0_10, %c0_11] : memref<256x32xf32, #tpu.memory_space<vmem>>, vector<256x32xf32>
    %cst_12 = arith.constant dense<0.000000e+00> : vector<2x32xf32>
    %14 = tpu.matmul %12, %13, %cst_12 {dimension_numbers = #tpu.dot_dimension_numbers<[1], [0], [0], [1], [0, 0, 1, 1], [], []>} : vector<2x256xf32>, vector<256x32xf32>, vector<2x32xf32> -> vector<2x32xf32>
    %c0_13 = arith.constant 0 : index
    %c0_14 = arith.constant 0 : index
    %15 = vector.load %arg7[%c0_13, %c0_14] : memref<1x32xf32, #tpu.memory_space<vmem>>, vector<1x32xf32>
    %16 = vector.broadcast %15 : vector<1x32xf32> to vector<2x32xf32>
    %17 = arith.addf %14, %16 : vector<2x32xf32>
    %18 = math.tanh %17 : vector<2x32xf32>
    %c0_15 = arith.constant 0 : index
    %c0_16 = arith.constant 0 : index
    %19 = vector.load %arg8[%c0_15, %c0_16] : memref<2x32xf32, #tpu.memory_space<vmem>>, vector<2x32xf32>
    tpu.vector_store %arg8[%c0_15, %c0_16], %18 {strides = array<i32>} : memref<2x32xf32, #tpu.memory_space<vmem>>, vector<2x32xf32>,
    return
  }
  func.func @transform_0(%arg0: i32) -> (i32, i32) {
    %c0_i32 = arith.constant 0 : i32
    %c0_i32_0 = arith.constant 0 : i32
    return %arg0, %c0_i32 : i32, i32
  }
  func.func @transform_1(%arg0: i32) -> (i32, i32) {
    %c0_i32 = arith.constant 0 : i32
    %c0_i32_0 = arith.constant 0 : i32
    %c0_i32_1 = arith.constant 0 : i32
    return %c0_i32, %c0_i32_0 : i32, i32
  }
  func.func @transform_2(%arg0: i32) -> (i32, i32) {
    %c0_i32 = arith.constant 0 : i32
    %c0_i32_0 = arith.constant 0 : i32
    %c0_i32_1 = arith.constant 0 : i32
    return %c0_i32, %c0_i32_0 : i32, i32
  }
  func.func @transform_3(%arg0: i32) -> (i32, i32) {
    %c0_i32 = arith.constant 0 : i32
    %c0_i32_0 = arith.constant 0 : i32
    %c0_i32_1 = arith.constant 0 : i32
    return %c0_i32, %c0_i32_0 : i32, i32
  }
  func.func @transform_4(%arg0: i32) -> (i32, i32) {
    %c0_i32 = arith.constant 0 : i32
    %c0_i32_0 = arith.constant 0 : i32
    %c0_i32_1 = arith.constant 0 : i32
    return %c0_i32, %c0_i32_0 : i32, i32
  }
  func.func @transform_5(%arg0: i32) -> (i32, i32) {
    %c0_i32 = arith.constant 0 : i32
    %c0_i32_0 = arith.constant 0 : i32
    %c0_i32_1 = arith.constant 0 : i32
    return %c0_i32, %c0_i32_0 : i32, i32
  }
  func.func @transform_6(%arg0: i32) -> (i32, i32) {
    %c0_i32 = arith.constant 0 : i32
    %c0_i32_0 = arith.constant 0 : i32
    %c0_i32_1 = arith.constant 0 : i32
    return %c0_i32, %c0_i32_0 : i32, i32
  }
  func.func @transform_7(%arg0: i32) -> (i32, i32) {
    %c0_i32 = arith.constant 0 : i32
    %c0_i32_0 = arith.constant 0 : i32
    return %arg0, %c0_i32 : i32, i32
  }
}

</mosaic_0001>

<bundles_post_ra>
// kernel: action_pred_forward.1
= control target key start
LH: loop header
LB: loop body
LE: loop exit
PB: predicated region body
PF: predicated region fallthrough
CT: control target
= control target key end

     0   :  { %v584_v3 = vmov 0.0   ;;  %vm403_vm0 = vcmask 254976   ;;  %s1024_s1 = inlined_call_operand.vmem [shape: f32[128,256], index: 1, kind: input, shape index: {}]   ;;  %s1025_s3 = inlined_call_operand.vmem [shape: f32[256,256], index: 3, kind: input, shape index: {}]   ;;  %s1026_s0 = inlined_call_operand.vmem [shape: f32[2,128], index: 0, kind: input, shape index: {}]   ;;  %s1027_s5 = inlined_call_operand.vmem [shape: f32[256,32], index: 5, kind: input, shape index: {}]   ;;  %s1028_s2 = inlined_call_operand.vmem [shape: f32[1,256], index: 2, kind: input, shape index: {}]   ;;  %s1029_s4 = inlined_call_operand.vmem [shape: f32[1,256], index: 4, kind: input, shape index: {}]   ;;  %s1030_s6 = inlined_call_operand.vmem [shape: f32[1,32], index: 6, kind: input, shape index: {}]   ;;  %s1031_s7 = inlined_call_operand.vmem [shape: f32[2,32], index: 7, kind: output, shape index: {}]  }
   0x1   :  { %v28_v0 = vld [vmem:[%s1024_s1 + $0x8] sm:$0xff]  ;;  %v30_v1 = vld [vmem:[%s1024_s1 + $0x18] sm:$0xff]  ;;  %v27_v2 = vld [vmem:[%s1024_s1] sm:$0xff]  ;;  %135 = vmatprep.mubr.f32.mxu0 %v584_v3 }
   0x2   :  { %v445_v4 = vpack.c.bf16 %v30_v1, %v28_v0  ;;  %v29_v5 = vld [vmem:[%s1024_s1 + $0x10] sm:$0xff]  ;;  %v32_v6 = vld [vmem:[%s1024_s1 + $0x28] sm:$0xff]  ;;  %v34_v7 = vld [vmem:[%s1024_s1 + $0x38] sm:$0xff] }
   0x3   :  { %v447_v8 = vpack.c.bf16 %v29_v5, %v27_v2  ;;  %v449_v9 = vpack.c.bf16 %v34_v7, %v32_v6  ;;  %v31_v10 = vld [vmem:[%s1024_s1 + $0x20] sm:$0xff]  ;;  %v33_v11 = vld [vmem:[%s1024_s1 + $0x30] sm:$0xff]  ;;  %v36_v12 = vld [vmem:[%s1024_s1 + $0x48] sm:$0xff] }
   0x4   :  { %446 = vmatprep.subr.bf16.mxu0 %v445_v4  ;;  %v38_v13 = vld [vmem:[%s1024_s1 + $0x58] sm:$0xff]  ;;  %v451_v14 = vpack.c.bf16 %v33_v11, %v31_v10  ;;  %v35_v16 = vld [vmem:[%s1024_s1 + $0x40] sm:$0xff]  ;;  %v37_v17 = vld [vmem:[%s1024_s1 + $0x50] sm:$0xff] }
   0x5   :  { %448 = vmatpush1.bf16.msra.mxu0 %v447_v8  ;;  %v453_v15 = vpack.c.bf16 %v38_v13, %v36_v12  ;;  %v40_v18 = vld [vmem:[%s1024_s1 + $0x68] sm:$0xff]  ;;  %v42_v19 = vld [vmem:[%s1024_s1 + $0x78] sm:$0xff]  ;;  %v455_v20 = vpack.c.bf16 %v37_v17, %v35_v16  ;;  %v39_v22 = vld [vmem:[%s1024_s1 + $0x60] sm:$0xff] }
   0x6   :  { %450 = vmatprep.subr.bf16.mxu0 %v449_v9  ;;  %v457_v21 = vpack.c.bf16 %v42_v19, %v40_v18  ;;  %v41_v23 = vld [vmem:[%s1024_s1 + $0x70] sm:$0xff]  ;;  %v44_v24 = vld [vmem:[%s1024_s1 + $0x88] sm:$0xff]  ;;  %v46_v25 = vld [vmem:[%s1024_s1 + $0x98] sm:$0xff] }
   0x7   :  { %v43_v26 = vld [vmem:[%s1024_s1 + $0x80] sm:$0xff]  ;;  %v45_v27 = vld [vmem:[%s1024_s1 + $0x90] sm:$0xff]  ;;  %v145_v28 = vld [vmem:[%s1025_s3 + $0x8] sm:$0xff]  ;;  %v459_v31 = vpack.c.bf16 %v41_v23, %v39_v22  ;;  %v461_v36 = vpack.c.bf16 %v46_v25, %v44_v24 }
   0x8   :  { %v147_v29 = vld [vmem:[%s1025_s3 + $0x18] sm:$0xff]  ;;  %v144_v30 = vld [vmem:[%s1025_s3] sm:$0xff]  ;;  %v146_v33 = vld [vmem:[%s1025_s3 + $0x10] sm:$0xff]  ;;  %v463_v46 = vpack.c.bf16 %v45_v27, %v43_v26 }
   0x9   :  { %452 = vmatpush1.bf16.msra.mxu0 %v451_v14  ;;  %v477_v32 = vpack.c.bf16 %v147_v29, %v145_v28  ;;  %v149_v34 = vld [vmem:[%s1025_s3 + $0x28] sm:$0xff]  ;;  %v151_v35 = vld [vmem:[%s1025_s3 + $0x38] sm:$0xff]  ;;  %v479_v37 = vpack.c.bf16 %v146_v33, %v144_v30  ;;  %v148_v39 = vld [vmem:[%s1025_s3 + $0x20] sm:$0xff] }
   0xa   :  { %454 = vmatprep.subr.bf16.mxu0 %v453_v15  ;;  %v481_v38 = vpack.c.bf16 %v151_v35, %v149_v34  ;;  %v150_v40 = vld [vmem:[%s1025_s3 + $0x30] sm:$0xff]  ;;  %v153_v41 = vld [vmem:[%s1025_s3 + $0x48] sm:$0xff]  ;;  %v50_v43 = vld [vmem:[%s1024_s1 + $0xb8] sm:$0xff] }
   0xb   :  { %v48_v42 = vld [vmem:[%s1024_s1 + $0xa8] sm:$0xff]  ;;  %478 = vmatprep.subr.bf16.mxu1 %v477_v32  ;;  %v155_v44 = vld [vmem:[%s1025_s3 + $0x58] sm:$0xff]  ;;  %v483_v45 = vpack.c.bf16 %v150_v40, %v148_v39  ;;  %v47_v47 = vld [vmem:[%s1024_s1 + $0xa0] sm:$0xff] }
   0xc   :  { %480 = vmatpush1.bf16.msra.mxu1 %v479_v37  ;;  %v485_v48 = vpack.c.bf16 %v155_v44, %v153_v41  ;;  %v152_v49 = vld [vmem:[%s1025_s3 + $0x40] sm:$0xff]  ;;  %v154_v50 = vld [vmem:[%s1025_s3 + $0x50] sm:$0xff]  ;;  %v465_v51 = vpack.c.bf16 %v50_v43, %v48_v42  ;;  %v157_v53 = vld [vmem:[%s1025_s3 + $0x68] sm:$0xff] }
   0xd   :  { %456 = vmatpush1.bf16.msra.mxu0 %v455_v20  ;;  %482 = vmatprep.subr.bf16.mxu1 %v481_v38  ;;  %v49_v52 = vld [vmem:[%s1024_s1 + $0xb0] sm:$0xff]  ;;  %v159_v54 = vld [vmem:[%s1025_s3 + $0x78] sm:$0xff]  ;;  %v52_v55 = vld [vmem:[%s1024_s1 + $0xc8] sm:$0xff]  ;;  %v487_v57 = vpack.c.bf16 %v154_v50, %v152_v49 }
   0xe   :  { %458 = vmatprep.subr.bf16.mxu0 %v457_v21  ;;  %v54_v56 = vld [vmem:[%s1024_s1 + $0xd8] sm:$0xff]  ;;  %v467_v58 = vpack.c.bf16 %v49_v52, %v47_v47  ;;  %v51_v59 = vld [vmem:[%s1024_s1 + $0xc0] sm:$0xff]  ;;  %v489_v60 = vpack.c.bf16 %v159_v54, %v157_v53  ;;  %v158_v62 = vld [vmem:[%s1025_s3 + $0x70] sm:$0xff] }
   0xf   :  { %v156_v61 = vld [vmem:[%s1025_s3 + $0x60] sm:$0xff]  ;;  %v469_v63 = vpack.c.bf16 %v54_v56, %v52_v55  ;;  %v53_v0 = vld [vmem:[%s1024_s1 + $0xd0] sm:$0xff]  ;;  %v161_v1 = vld [vmem:[%s1025_s3 + $0x88] sm:$0xff] }
  0x10   :  { %484 = vmatpush1.bf16.msra.mxu1 %v483_v45  ;;  %v163_v2 = vld [vmem:[%s1025_s3 + $0x98] sm:$0xff]  ;;  %v56_v3 = vld [vmem:[%s1024_s1 + $0xe8] sm:$0xff]  ;;  %v491_v5 = vpack.c.bf16 %v158_v62, %v156_v61  ;;  %v471_v6 = vpack.c.bf16 %v53_v0, %v51_v59  ;;  %v55_v7 = vld [vmem:[%s1024_s1 + $0xe0] sm:$0xff] }
  0x11   :  { %460 = vmatpush1.bf16.msra.mxu0 %v459_v31  ;;  %486 = vmatprep.subr.bf16.mxu1 %v485_v48  ;;  %v58_v4 = vld [vmem:[%s1024_s1 + $0xf8] sm:$0xff]  ;;  %v493_v8 = vpack.c.bf16 %v163_v2, %v161_v1  ;;  %v160_v9 = vld [vmem:[%s1025_s3 + $0x80] sm:$0xff]  ;;  %v162_v10 = vld [vmem:[%s1025_s3 + $0x90] sm:$0xff] }
  0x12   :  { %462 = vmatprep.subr.bf16.mxu0 %v461_v36  ;;  %v473_v11 = vpack.c.bf16 %v58_v4, %v56_v3  ;;  %v57_v12 = vld [vmem:[%s1024_s1 + $0xf0] sm:$0xff]  ;;  %v165_v13 = vld [vmem:[%s1025_s3 + $0xa8] sm:$0xff]  ;;  %v167_v14 = vld [vmem:[%s1025_s3 + $0xb8] sm:$0xff]  ;;  %v495_v15 = vpack.c.bf16 %v162_v10, %v160_v9 }
  0x13   :  { %v475_v16 = vpack.c.bf16 %v57_v12, %v55_v7  ;;  %v497_v17 = vpack.c.bf16 %v167_v14, %v165_v13  ;;  %v164_v18 = vld [vmem:[%s1025_s3 + $0xa0] sm:$0xff]  ;;  %v166_v19 = vld [vmem:[%s1025_s3 + $0xb0] sm:$0xff]  ;;  %v169_v20 = vld [vmem:[%s1025_s3 + $0xc8] sm:$0xff] }
  0x14   :  { %488 = vmatpush1.bf16.msra.mxu1 %v487_v57  ;;  %v171_v21 = vld [vmem:[%s1025_s3 + $0xd8] sm:$0xff]  ;;  %v499_v22 = vpack.c.bf16 %v166_v19, %v164_v18  ;;  %v26_v23 = vld [vmem:[%s1026_s0] sm:$0x3]  ;;  %v170_v26 = vld [vmem:[%s1025_s3 + $0xd0] sm:$0xff] }
  0x15   :  { %464 = vmatpush1.bf16.msra.mxu0 %v463_v46  ;;  %490 = vmatprep.subr.bf16.mxu1 %v489_v60  ;;  %v501_v24 = vpack.c.bf16 %v171_v21, %v169_v20  ;;  %v168_v25 = vld [vmem:[%s1025_s3 + $0xc0] sm:$0xff]  ;;  %v173_v27 = vld [vmem:[%s1025_s3 + $0xe8] sm:$0xff]  ;;  %v175_v28 = vld [vmem:[%s1025_s3 + $0xf8] sm:$0xff] }
  0x16   :  { %466 = vmatprep.subr.bf16.mxu0 %v465_v51  ;;  %v503_v29 = vpack.c.bf16 %v170_v26, %v168_v25  ;;  %v505_v30 = vpack.c.bf16 %v175_v28, %v173_v27  ;;  %v172_v31 = vld [vmem:[%s1025_s3 + $0xe0] sm:$0xff]  ;;  %v174_v32 = vld [vmem:[%s1025_s3 + $0xf0] sm:$0xff]  ;;  %v177_v33 = vld [vmem:[%s1025_s3 + $0x108] sm:$0xff] }
  0x17   :  { %v179_v34 = vld [vmem:[%s1025_s3 + $0x118] sm:$0xff]  ;;  %v507_v35 = vpack.c.bf16 %v174_v32, %v172_v31  ;;  %v176_v37 = vld [vmem:[%s1025_s3 + $0x100] sm:$0xff]  ;;  %v178_v38 = vld [vmem:[%s1025_s3 + $0x110] sm:$0xff] }
  0x18   :  { %492 = vmatpush1.bf16.msra.mxu1 %v491_v5  ;;  %v509_v36 = vpack.c.bf16 %v179_v34, %v177_v33  ;;  %v181_v39 = vld [vmem:[%s1025_s3 + $0x128] sm:$0xff]  ;;  %v183_v40 = vld [vmem:[%s1025_s3 + $0x138] sm:$0xff]  ;;  %v511_v41 = vpack.c.bf16 %v178_v38, %v176_v37  ;;  %v180_v43 = vld [vmem:[%s1025_s3 + $0x120] sm:$0xff] }
  0x19   :  { %468 = vmatpush1.bf16.msra.mxu0 %v467_v58  ;;  %494 = vmatprep.subr.bf16.mxu1 %v493_v8  ;;  %v513_v42 = vpack.c.bf16 %v183_v40, %v181_v39  ;;  %v182_v44 = vld [vmem:[%s1025_s3 + $0x130] sm:$0xff]  ;;  %v185_v45 = vld [vmem:[%s1025_s3 + $0x148] sm:$0xff]  ;;  %v187_v46 = vld [vmem:[%s1025_s3 + $0x158] sm:$0xff] }
  0x1a   :  { %470 = vmatprep.subr.bf16.mxu0 %v469_v63  ;;  %v515_v47 = vpack.c.bf16 %v182_v44, %v180_v43  ;;  %v517_v48 = vpack.c.bf16 %v187_v46, %v185_v45  ;;  %v184_v49 = vld [vmem:[%s1025_s3 + $0x140] sm:$0xff]  ;;  %v186_v50 = vld [vmem:[%s1025_s3 + $0x150] sm:$0xff]  ;;  %v189_v51 = vld [vmem:[%s1025_s3 + $0x168] sm:$0xff] }
  0x1b   :  { %v191_v52 = vld [vmem:[%s1025_s3 + $0x178] sm:$0xff]  ;;  %v519_v53 = vpack.c.bf16 %v186_v50, %v184_v49  ;;  %v188_v55 = vld [vmem:[%s1025_s3 + $0x160] sm:$0xff]  ;;  %v190_v56 = vld [vmem:[%s1025_s3 + $0x170] sm:$0xff] }
  0x1c   :  { %496 = vmatpush1.bf16.msra.mxu1 %v495_v15  ;;  %v521_v54 = vpack.c.bf16 %v191_v52, %v189_v51  ;;  %v523_v57 = vpack.c.bf16 %v190_v56, %v188_v55  ;;  %v193_v58 = vld [vmem:[%s1025_s3 + $0x188] sm:$0xff]  ;;  %v195_v59 = vld [vmem:[%s1025_s3 + $0x198] sm:$0xff]  ;;  %v192_v61 = vld [vmem:[%s1025_s3 + $0x180] sm:$0xff] }
  0x1d   :  { %472 = vmatpush1.bf16.msra.mxu0 %v471_v6  ;;  %498 = vmatprep.subr.bf16.mxu1 %v497_v17  ;;  %v525_v60 = vpack.c.bf16 %v195_v59, %v193_v58  ;;  %v194_v62 = vld [vmem:[%s1025_s3 + $0x190] sm:$0xff]  ;;  %v197_v0 = vld [vmem:[%s1025_s3 + $0x1a8] sm:$0xff]  ;;  %v199_v1 = vld [vmem:[%s1025_s3 + $0x1b8] sm:$0xff] }
  0x1e   :  { %474 = vmatprep.subr.bf16.mxu0 %v473_v11  ;;  %v527_v63 = vpack.c.bf16 %v194_v62, %v192_v61  ;;  %v529_v2 = vpack.c.bf16 %v199_v1, %v197_v0  ;;  %v196_v3 = vld [vmem:[%s1025_s3 + $0x1a0] sm:$0xff]  ;;  %v198_v4 = vld [vmem:[%s1025_s3 + $0x1b0] sm:$0xff]  ;;  %v201_v6 = vld [vmem:[%s1025_s3 + $0x1c8] sm:$0xff] }
  0x1f   :  { %v531_v5 = vpack.c.bf16 %v198_v4, %v196_v3  ;;  %v203_v7 = vld [vmem:[%s1025_s3 + $0x1d8] sm:$0xff]  ;;  %v200_v8 = vld [vmem:[%s1025_s3 + $0x1c0] sm:$0xff]  ;;  %v202_v10 = vld [vmem:[%s1025_s3 + $0x1d0] sm:$0xff] }
  0x20   :  { %500 = vmatpush1.bf16.msra.mxu1 %v499_v22  ;;  %v533_v9 = vpack.c.bf16 %v203_v7, %v201_v6  ;;  %v205_v11 = vld [vmem:[%s1025_s3 + $0x1e8] sm:$0xff]  ;;  %v207_v12 = vld [vmem:[%s1025_s3 + $0x1f8] sm:$0xff]  ;;  %v535_v13 = vpack.c.bf16 %v202_v10, %v200_v8  ;;  %v204_v15 = vld [vmem:[%s1025_s3 + $0x1e0] sm:$0xff] }
  0x21   :  { %476 = vmatpush1.bf16.msra.mxu0 %v475_v16  ;;  %502 = vmatprep.subr.bf16.mxu1 %v501_v24  ;;  %v537_v14 = vpack.c.bf16 %v207_v12, %v205_v11  ;;  %v206_v16 = vld [vmem:[%s1025_s3 + $0x1f0] sm:$0xff]  ;;  %v309_v18 = vld [vmem:[%s1027_s5 + $0x80] sm:$0xff]  ;;  %v310_v19 = vld [vmem:[%s1027_s5 + $0x88] sm:$0xff] }
  0x22   :  { %v539_v17 = vpack.c.bf16 %v206_v16, %v204_v15  ;;  %v293_v20 = vld [vmem:[%s1027_s5] sm:$0xff]  ;;  %v541_v21 = vpack.c.bf16 %v310_v19, %v309_v18  ;;  %v294_v22 = vld [vmem:[%s1027_s5 + $0x8] sm:$0xff]  ;;  %v312_v24 = vld [vmem:[%s1027_s5 + $0x98] sm:$0xff] }
  0x23   :  { %v543_v25 = vpack.c.bf16 %v294_v22, %v293_v20  ;;  %v295_v27 = vld [vmem:[%s1027_s5 + $0x10] sm:$0xff]  ;;  %v296_v28 = vld [vmem:[%s1027_s5 + $0x18] sm:$0xff]  ;;  %v297_v33 = vld [vmem:[%s1027_s5 + $0x20] sm:$0xff] }
  0x24   :  { %136 = vmatmul.mubr.f32.vlgmr.msra.gmra.mrb[0].mxu0 %v26_v23  ;;  %504 = vmatpush1.bf16.msra.mxu1 %v503_v29  ;;  %v311_v23 = vld [vmem:[%s1027_s5 + $0x90] sm:$0xff]  ;;  %v313_v29 = vld [vmem:[%s1027_s5 + $0xa0] sm:$0xff]  ;;  %v547_v31 = vpack.c.bf16 %v296_v28, %v295_v27  ;;  %v298_v34 = vld [vmem:[%s1027_s5 + $0x28] sm:$0xff] }
  0x25   :  { %506 = vmatprep.subr.bf16.mxu1 %v505_v30  ;;  %v545_v26 = vpack.c.bf16 %v312_v24, %v311_v23  ;;  %542 = vmatprep.subr.bf16.mxu0 %v541_v21  ;;  %v314_v30 = vld [vmem:[%s1027_s5 + $0xa8] sm:$0xff]  ;;  %v551_v37 = vpack.c.bf16 %v298_v34, %v297_v33  ;;  %v299_v39 = vld [vmem:[%s1027_s5 + $0x30] sm:$0xff]  ;;  %v300_v40 = vld [vmem:[%s1027_s5 + $0x38] sm:$0xff] }
  0x26   :  { %544 = vmatpush3.bf16.msra.mxu0 %v543_v25  ;;  %v549_v32 = vpack.c.bf16 %v314_v30, %v313_v29  ;;  %v59_v45 = vld [vmem:[%s1028_s2] sm:$0x3]  ;;  %v318_v56 = vld [vmem:[%s1027_s5 + $0xc8] sm:$0xff]  ;;  %v319_v61 = vld [vmem:[%s1027_s5 + $0xd0] sm:$0xff] }
  0x27   :  { %546 = vmatprep.subr.bf16.mxu0 %v545_v26  ;;  %v317_v55 = vld [vmem:[%s1027_s5 + $0xc0] sm:$0xff]  ;;  %v302_v59 = vld [vmem:[%s1027_s5 + $0x48] sm:$0xff]  ;;  %v320_v62 = vld [vmem:[%s1027_s5 + $0xd8] sm:$0xff] }
  0x28   :  { %508 = vmatpush1.bf16.msra.mxu1 %v507_v35  ;;  %v315_v35 = vld [vmem:[%s1027_s5 + $0xb0] sm:$0xff]  ;;  %v301_v58 = vld [vmem:[%s1027_s5 + $0x40] sm:$0xff]  ;;  %v304_v1 = vld [vmem:[%s1027_s5 + $0x58] sm:$0xff] }
  0x29   :  { %510 = vmatprep.subr.bf16.mxu1 %v509_v36  ;;  %v316_v36 = vld [vmem:[%s1027_s5 + $0xb8] sm:$0xff]  ;;  %v303_v0 = vld [vmem:[%s1027_s5 + $0x50] sm:$0xff]  ;;  %v321_v3 = vld [vmem:[%s1027_s5 + $0xe0] sm:$0xff] }
  0x2a   :  { %548 = vmatpush3.bf16.msra.mxu0 %v547_v31  ;;  %v553_v38 = vpack.c.bf16 %v316_v36, %v315_v35  ;;  %v322_v4 = vld [vmem:[%s1027_s5 + $0xe8] sm:$0xff]  ;;  %v323_v8 = vld [vmem:[%s1027_s5 + $0xf0] sm:$0xff]  ;;  %v208_v15 = vld [vmem:[%s1029_s4] sm:$0x3] }
  0x2b   :  { %550 = vmatprep.subr.bf16.mxu0 %v549_v32  ;;  %v565_v6 = vpack.c.bf16 %v322_v4, %v321_v3  ;;  %v306_v7 = vld [vmem:[%s1027_s5 + $0x68] sm:$0xff]  ;;  %v307_v12 = vld [vmem:[%s1027_s5 + $0x70] sm:$0xff]  ;;  %v409_v25 = vld [vmem:[%s1030_s6] ss:$0 sm:$0xff] }
  0x2c   :  { %512 = vmatpush1.bf16.msra.mxu1 %v511_v41  ;;  %v555_v41 = vpack.c.bf16 %v300_v40, %v299_v39 }
  0x2d   :  { %514 = vmatprep.subr.bf16.mxu1 %v513_v42  ;;  %v61_v42 = vlaneseq }
  0x2e   :  { %552 = vmatpush3.bf16.msra.mxu0 %v551_v37 }
  0x2f   :  { %554 = vmatprep.subr.bf16.mxu0 %v553_v38  ;;  %v62_v43 = vshrl.u32 %v61_v42, 7 }
  0x30   :  { %516 = vmatpush1.bf16.msra.mxu1 %v515_v47 }
  0x31   :  { %518 = vmatprep.subr.bf16.mxu1 %v517_v48  ;;  %v63_v44 = vsub.s32 0, %v62_v43  ;;  %v67_v46 = vsub.s32 1, %v62_v43 }
  0x32   :  { %556 = vmatpush3.bf16.msra.mxu0 %v555_v41 }
  0x33   :  { %v64_v47 = vrot.slane %v59_v45, %v63_v44  ;;  %v68_v48 = vrot.slane %v59_v45, %v67_v46  ;;  %v213_v16 = vrot.slane %v208_v15, %v63_v44 }
  0x34   :  { %520 = vmatpush1.bf16.msra.mxu1 %v519_v53 }
  0x35   :  { %522 = vmatprep.subr.bf16.mxu1 %v521_v54 }
  0x38   :  { %524 = vmatpush1.bf16.msra.mxu1 %v523_v57  ;;  %v557_v57 = vpack.c.bf16 %v318_v56, %v317_v55 }
  0x39   :  { %526 = vmatprep.subr.bf16.mxu1 %v525_v60  ;;  %v559_v60 = vpack.c.bf16 %v302_v59, %v301_v58 }
  0x3a   :  { %558 = vmatprep.subr.bf16.mxu0 %v557_v57 }
  0x3b   :  { %560 = vmatpush3.bf16.msra.mxu0 %v559_v60 }
  0x3c   :  { %528 = vmatpush1.bf16.msra.mxu1 %v527_v63  ;;  %v561_v63 = vpack.c.bf16 %v320_v62, %v319_v61 }
  0x3d   :  { %530 = vmatprep.subr.bf16.mxu1 %v529_v2  ;;  %v563_v2 = vpack.c.bf16 %v304_v1, %v303_v0 }
  0x3e   :  { %562 = vmatprep.subr.bf16.mxu0 %v561_v63 }
  0x3f   :  { %564 = vmatpush3.bf16.msra.mxu0 %v563_v2 }
  0x40   :  { %532 = vmatpush1.bf16.msra.mxu1 %v531_v5  ;;  %v305_v5 = vld [vmem:[%s1027_s5 + $0x60] sm:$0xff]  ;;  %566 = vmatprep.subr.bf16.mxu0 %v565_v6 }
  0x41   :  { %534 = vmatprep.subr.bf16.mxu1 %v533_v9  ;;  %v324_v9 = vld [vmem:[%s1027_s5 + $0xf8] sm:$0xff]  ;;  %v567_v10 = vpack.c.bf16 %v306_v7, %v305_v5 }
  0x42   :  { %v569_v11 = vpack.c.bf16 %v324_v9, %v323_v8 }
  0x43   :  { %568 = vmatpush3.bf16.msra.mxu0 %v567_v10 }
  0x44   :  { %536 = vmatpush1.bf16.msra.mxu1 %v535_v13  ;;  %v308_v13 = vld [vmem:[%s1027_s5 + $0x78] sm:$0xff]  ;;  %570 = vmatprep.subr.bf16.mxu0 %v569_v11 }
  0x45   :  { %538 = vmatprep.subr.bf16.mxu1 %v537_v14  ;;  %v571_v14 = vpack.c.bf16 %v308_v13, %v307_v12 }
  0x47   :  { %572 = vmatpush3.bf16.msra.mxu0 %v571_v14 }
  0x48   :  { %540 = vmatpush1.bf16.msra.mxu1 %v539_v17  ;;  %v217_v17 = vrot.slane %v208_v15, %v67_v46 }
  0xf7   :  { %v137_v49 = vpop.f32.mrb[0].mxu0 }
  0xf8   :  { %v138_v50 = vadd.f32 %v137_v49, %v64_v47  ;;  %v139_v51 = vpop.f32.mrb[1].mxu0 }
  0xf9   :  { %v140_v52 = vadd.f32 %v139_v51, %v68_v48 }
  0xfb   :  { %574 = vtanh.f32 %v140_v52 }
  0xfc   :  { %576 = vtanh.f32 %v138_v50 }
 0x105   :  { %v575_v53 = vpop.eup %574 }
 0x106   :  { %v577_v54 = vpop.eup %576  ;;  %284 = vmatprep.mubr.f32.mxu1 %v575_v53 }
 0x107   :  { %285 = vmatmul.mubr.f32.vlgmr.msra.gmra.mrb[0].mxu1 %v577_v54 }
 0x1da   :  { %v286_v18 = vpop.f32.mrb[0].mxu1 }
 0x1db   :  { %v287_v19 = vadd.f32 %v286_v18, %v213_v16  ;;  %v288_v20 = vpop.f32.mrb[1].mxu1 }
 0x1dc   :  { %v289_v21 = vadd.f32 %v288_v20, %v217_v17 }
 0x1de   :  { %578 = vtanh.f32 %v289_v21 }
 0x1df   :  { %580 = vtanh.f32 %v287_v19 }
 0x1e8   :  { %v579_v22 = vpop.eup %578 }
 0x1e9   :  { %v581_v23 = vpop.eup %580  ;;  %396 = vmatprep.mubr.f32.mxu0 %v579_v22 }
 0x1ea   :  { %397 = vmatmul.mubr.f32.vlgmr.msra.gmra.mrb[2].mxu0 %v581_v23 }
 0x2bd   :  { %v442_v24 = vpop.f32.mrb[2].mxu0 }
 0x2be   :  { %v443_v26 = vpop.f32.mrb[3].mxu0 }
 0x2bf   :  { %v444_v27 = vadd.f32 %v443_v26, %v442_v24 }
 0x2c1   :  { %v399_v28 = vadd.f32 %v444_v27, %v409_v25 }
 0x2c3   :  { %582 = vtanh.f32 %v399_v28 }
 0x2cd   :  { %v583_v29 = vpop.eup %582 }
 0x2ce   :  { %404 = vst.msk [vmem:[%s1031_s7] sm:$0x3] %vm403_vm0, %v583_v29 }

</bundles_post_ra>
